<compile_context>
chip_gen: v5e
topology: v5e:2x2
jax: 0.10.0
libtpu: 0.0.40
codegen_flags: <defaults>
</compile_context>

<pallas_src>
import jax
import jax.numpy as jnp
from jax.experimental import pallas as pl
from jax.experimental.pallas import tpu as pltpu

INPUT_SHAPE = 784
HIDDEN_SHAPE = 64
OUTPUT_SHAPE = 10

HID_PAD = 128          # hidden dim padded to a full lane width
OUT_PAD = 128          # output dim padded to a full lane width (lane-dense stores)
DEFAULT_BLOCK_BATCH = 1024   # bf16 x tile ~1.6 MiB; x2 buffers + weights << 16 MiB


def _round_up(n, m):
    return ((n + m - 1) // m) * m


def mlp_kernel(x_ref, w1_ref, b1_ref, w2_ref, b2_ref, o_ref):
    # Layer 1: MXU matmul (bf16 inputs, f32 accumulation), bias + ReLU in f32 (VPU).
    h = jnp.dot(x_ref[...], w1_ref[...], preferred_element_type=jnp.float32)
    h = jnp.maximum(h + b1_ref[...], 0.0)
    # Layer 2: cast activation to bf16 to feed the MXU again, accumulate in f32.
    y = jnp.dot(h.astype(jnp.bfloat16), w2_ref[...], preferred_element_type=jnp.float32)
    o_ref[...] = (y + b2_ref[...]).astype(o_ref.dtype)


def simple_module_forward(x, w1, b1, w2, b2, *, block_batch=DEFAULT_BLOCK_BATCH):
    """y = relu(x @ w1 + b1) @ w2 + b2, with w1:[784,64], w2:[64,10]."""
    batch, in_dim = x.shape
    hid = w1.shape[1]
    out = w2.shape[1]
    b1 = b1.reshape(1, -1)
    b2 = b2.reshape(1, -1)

    # --- prepare padded / quantized operands (cheap, done once per call) ------
    w1p = jnp.zeros((in_dim, HID_PAD), jnp.bfloat16).at[:, :hid].set(
        w1.astype(jnp.bfloat16))
    b1p = jnp.zeros((1, HID_PAD), jnp.float32).at[:, :hid].set(
        b1.astype(jnp.float32))
    w2p = jnp.zeros((HID_PAD, OUT_PAD), jnp.bfloat16).at[:hid, :out].set(
        w2.astype(jnp.bfloat16))
    b2p = jnp.zeros((1, OUT_PAD), jnp.float32).at[:, :out].set(
        b2.astype(jnp.float32))

    # --- batch tiling: pad batch to a multiple of the tile ---------------------
    tb = min(block_batch, _round_up(batch, 16))        # 16 rows = one bf16 vreg sublane pack
    padded_batch = _round_up(batch, tb)
    xb = x.astype(jnp.bfloat16)
    if padded_batch != batch:
        xb = jnp.pad(xb, ((0, padded_batch - batch), (0, 0)))
    grid = (padded_batch // tb,)

    cost = pl.CostEstimate(
        flops=2 * padded_batch * (in_dim * HID_PAD + HID_PAD * OUT_PAD),
        transcendentals=0,
        bytes_accessed=(padded_batch * in_dim * 2            # x (bf16)
                        + in_dim * HID_PAD * 2                # w1
                        + HID_PAD * OUT_PAD * 2               # w2
                        + (HID_PAD + OUT_PAD) * 4             # biases
                        + padded_batch * OUT_PAD * 4))        # output (f32)

    out_padded = pl.pallas_call(
        mlp_kernel,
        out_shape=jax.ShapeDtypeStruct((padded_batch, OUT_PAD), jnp.float32),
        grid=grid,
        in_specs=[
            pl.BlockSpec((tb, in_dim), lambda i: (i, 0)),        # x tile (pipelined)
            pl.BlockSpec((in_dim, HID_PAD), lambda i: (0, 0)),   # w1 (resident)
            pl.BlockSpec((1, HID_PAD), lambda i: (0, 0)),        # b1 (resident)
            pl.BlockSpec((HID_PAD, OUT_PAD), lambda i: (0, 0)),  # w2 (resident)
            pl.BlockSpec((1, OUT_PAD), lambda i: (0, 0)),        # b2 (resident)
        ],
        out_specs=pl.BlockSpec((tb, OUT_PAD), lambda i: (i, 0)),
        compiler_params=pltpu.CompilerParams(
            dimension_semantics=("parallel",)),                  # shards across v7x's 2 TCs
        cost_estimate=cost,
    )(xb, w1p, b1p, w2p, b2p)

    # Drop batch padding and the zero-padded output lanes.
    return out_padded[:batch, :out]


def init_params(key):
    # Deterministic init mimicking PyTorch's default uniform(-1/sqrt(fan_in), ...).
    k1, k2, k3, k4 = jax.random.split(key, 4)
    lim1 = 1.0 / (INPUT_SHAPE ** 0.5)
    lim2 = 1.0 / (HIDDEN_SHAPE ** 0.5)
    w1 = jax.random.uniform(k1, (INPUT_SHAPE, HIDDEN_SHAPE), jnp.float32, -lim1, lim1)
    b1 = jax.random.uniform(k2, (1, HIDDEN_SHAPE), jnp.float32, -lim1, lim1)
    w2 = jax.random.uniform(k3, (HIDDEN_SHAPE, OUTPUT_SHAPE), jnp.float32, -lim2, lim2)
    b2 = jax.random.uniform(k4, (1, OUTPUT_SHAPE), jnp.float32, -lim2, lim2)
    return w1, b1, w2, b2


if __name__ == "__main__":
    key = jax.random.PRNGKey(0)
    k_params, k_x = jax.random.split(key)
    w1, b1, w2, b2 = init_params(k_params)

    batch = 8
    x = jax.random.normal(k_x, (batch, INPUT_SHAPE), jnp.float32)

    out = simple_module_forward(x, w1, b1, w2, b2)
    out = jax.block_until_ready(out)
    assert out.shape == (batch, OUTPUT_SHAPE)

    # Reference with the same bf16 casts the kernel performs (tight check).
    xb = x.astype(jnp.bfloat16).astype(jnp.float32)
    w1b = w1.astype(jnp.bfloat16).astype(jnp.float32)
    w2b = w2.astype(jnp.bfloat16).astype(jnp.float32)
    h_ref = jnp.maximum(xb @ w1b + b1, 0.0)
    ref_bf16 = h_ref.astype(jnp.bfloat16).astype(jnp.float32) @ w2b + b2
    assert jnp.allclose(out, ref_bf16, atol=1e-2, rtol=1e-2)

    # Sanity check vs the pure-f32 PyTorch-equivalent math (loose, bf16 quantization).
    ref_f32 = jnp.maximum(x @ w1 + b1, 0.0) @ w2 + b2
    assert jnp.allclose(out, ref_f32, atol=1e-1, rtol=1e-1)

    print("KERNEL_OK")
</pallas_src>

<mosaic_0001>
module attributes {stable_mosaic.version = 11 : i64} {
  func.func @mlp_kernel(%arg0: i32, %arg1: memref<16x784xbf16, #tpu.memory_space<vmem>>, %arg2: memref<784x128xbf16, #tpu.memory_space<vmem>>, %arg3: memref<1x128xf32, #tpu.memory_space<vmem>>, %arg4: memref<128x128xbf16, #tpu.memory_space<vmem>>, %arg5: memref<1x128xf32, #tpu.memory_space<vmem>>, %arg6: memref<16x128xf32, #tpu.memory_space<vmem>>) attributes {dimension_semantics = [#tpu.dimension_semantics<parallel>], iteration_bounds = array<i64: 1>, scalar_prefetch = 0 : i64, scratch_operands = 0 : i64, tpu.core_type = #tpu.core_type<tc>, window_params = [{transform_indices = @transform_0, window_bounds = array<i64: 16, 784>}, {pipeline_mode = #tpu.pipeline_mode<synchronous>, transform_indices = @transform_1, window_bounds = array<i64: 784, 128>}, {pipeline_mode = #tpu.pipeline_mode<synchronous>, transform_indices = @transform_2, window_bounds = array<i64: 1, 128>}, {pipeline_mode = #tpu.pipeline_mode<synchronous>, transform_indices = @transform_3, window_bounds = array<i64: 128, 128>}, {pipeline_mode = #tpu.pipeline_mode<synchronous>, transform_indices = @transform_4, window_bounds = array<i64: 1, 128>}, {transform_indices = @transform_5, window_bounds = array<i64: 16, 128>}]} {
    %c0 = arith.constant 0 : index
    %c0_0 = arith.constant 0 : index
    %0 = vector.load %arg1[%c0, %c0_0] : memref<16x784xbf16, #tpu.memory_space<vmem>>, vector<16x784xbf16>
    %c0_1 = arith.constant 0 : index
    %c0_2 = arith.constant 0 : index
    %1 = vector.load %arg2[%c0_1, %c0_2] : memref<784x128xbf16, #tpu.memory_space<vmem>>, vector<784x128xbf16>
    %cst = arith.constant dense<0.000000e+00> : vector<16x128xf32>
    %2 = tpu.matmul %0, %1, %cst {dimension_numbers = #tpu.dot_dimension_numbers<[1], [0], [0], [1], [0, 0, 1, 1], [], []>} : vector<16x784xbf16>, vector<784x128xbf16>, vector<16x128xf32> -> vector<16x128xf32>
    %c0_3 = arith.constant 0 : index
    %c0_4 = arith.constant 0 : index
    %3 = vector.load %arg3[%c0_3, %c0_4] : memref<1x128xf32, #tpu.memory_space<vmem>>, vector<1x128xf32>
    %4 = vector.broadcast %3 : vector<1x128xf32> to vector<16x128xf32>
    %5 = arith.addf %2, %4 : vector<16x128xf32>
    %cst_5 = arith.constant 0.000000e+00 : f32
    %6 = vector.broadcast %cst_5 : f32 to vector<16x128xf32>
    %7 = arith.maximumf %5, %6 : vector<16x128xf32>
    %8 = arith.truncf %7 : vector<16x128xf32> to vector<16x128xbf16>
    %c0_6 = arith.constant 0 : index
    %c0_7 = arith.constant 0 : index
    %9 = vector.load %arg4[%c0_6, %c0_7] : memref<128x128xbf16, #tpu.memory_space<vmem>>, vector<128x128xbf16>
    %cst_8 = arith.constant dense<0.000000e+00> : vector<16x128xf32>
    %10 = tpu.matmul %8, %9, %cst_8 {dimension_numbers = #tpu.dot_dimension_numbers<[1], [0], [0], [1], [0, 0, 1, 1], [], []>} : vector<16x128xbf16>, vector<128x128xbf16>, vector<16x128xf32> -> vector<16x128xf32>
    %c0_9 = arith.constant 0 : index
    %c0_10 = arith.constant 0 : index
    %11 = vector.load %arg5[%c0_9, %c0_10] : memref<1x128xf32, #tpu.memory_space<vmem>>, vector<1x128xf32>
    %12 = vector.broadcast %11 : vector<1x128xf32> to vector<16x128xf32>
    %13 = arith.addf %10, %12 : vector<16x128xf32>
    %c0_11 = arith.constant 0 : index
    %c0_12 = arith.constant 0 : index
    %14 = vector.load %arg6[%c0_11, %c0_12] : memref<16x128xf32, #tpu.memory_space<vmem>>, vector<16x128xf32>
    tpu.vector_store %arg6[%c0_11, %c0_12], %13 {strides = array<i32>} : memref<16x128xf32, #tpu.memory_space<vmem>>, vector<16x128xf32>,
    return
  }
  func.func @transform_0(%arg0: i32) -> (i32, i32) {
    %c0_i32 = arith.constant 0 : i32
    %c0_i32_0 = arith.constant 0 : i32
    return %arg0, %c0_i32 : i32, i32
  }
  func.func @transform_1(%arg0: i32) -> (i32, i32) {
    %c0_i32 = arith.constant 0 : i32
    %c0_i32_0 = arith.constant 0 : i32
    %c0_i32_1 = arith.constant 0 : i32
    return %c0_i32, %c0_i32_0 : i32, i32
  }
  func.func @transform_2(%arg0: i32) -> (i32, i32) {
    %c0_i32 = arith.constant 0 : i32
    %c0_i32_0 = arith.constant 0 : i32
    %c0_i32_1 = arith.constant 0 : i32
    return %c0_i32, %c0_i32_0 : i32, i32
  }
  func.func @transform_3(%arg0: i32) -> (i32, i32) {
    %c0_i32 = arith.constant 0 : i32
    %c0_i32_0 = arith.constant 0 : i32
    %c0_i32_1 = arith.constant 0 : i32
    return %c0_i32, %c0_i32_0 : i32, i32
  }
  func.func @transform_4(%arg0: i32) -> (i32, i32) {
    %c0_i32 = arith.constant 0 : i32
    %c0_i32_0 = arith.constant 0 : i32
    %c0_i32_1 = arith.constant 0 : i32
    return %c0_i32, %c0_i32_0 : i32, i32
  }
  func.func @transform_5(%arg0: i32) -> (i32, i32) {
    %c0_i32 = arith.constant 0 : i32
    %c0_i32_0 = arith.constant 0 : i32
    return %arg0, %c0_i32 : i32, i32
  }
}

</mosaic_0001>

<bundles_post_ra>
// kernel: tpu_custom_call.1
= control target key start
LH: loop header
LB: loop body
LE: loop exit
PB: predicated region body
PF: predicated region fallthrough
CT: control target
= control target key end

     0   :  { %10 = vsyncpa [#allocation3], 0  ;;  %s1210_s0 = inlined_call_operand.hbm [shape: bf16[16,784], index: 0, kind: input, shape index: {}]   ;;  %s1211_s1 = inlined_call_operand.hbm [shape: bf16[784,128], index: 1, kind: input, shape index: {}]   ;;  %s1212_s2 = inlined_call_operand.vmem [shape: f32[1,128], index: 2, kind: input, shape index: {}]   ;;  %s1213_s3 = inlined_call_operand.hbm [shape: bf16[128,128], index: 3, kind: input, shape index: {}]   ;;  %s1214_s4 = inlined_call_operand.vmem [shape: f32[1,128], index: 4, kind: input, shape index: {}]   ;;  %s1215_s5 = inlined_call_operand.hbm [shape: f32[16,128], index: 5, kind: output, shape index: {}]  }
   0x1   :  { %11 = vsyncpa [#allocation6], 0  ;;  %s30_s20 = sshll.u32 %s1211_s1, 4  ;;  %s31_s20 = int_to_ptr.hbm [resolvable:$true] %s30_s20 }
   0x2   :  { %12 = vsyncpa [#allocation4], 0  ;;  %s1152_s21 = smov [#allocation5]   ;;  %s17_s25 = sshll.u32 %s1210_s0, 4  ;;  %s18_s25 = int_to_ptr.hbm [resolvable:$true] %s17_s25 }
   0x3   :  { %s32_s22 = sshll.u32 %s1152_s21, 4  ;;  %s1153_s26 = smov 64   ;;  %s33_s22 = int_to_ptr.vmem [resolvable:$true] %s32_s22 }
   0x4   :  { %s1154_s27 = smov 4   ;;  %s1155_s28 = smov [#allocation2]  }
   0x5   :  { %38 = dma.hbm_to_vmem [thread:$0]  %s31_s20, 6272, %s33_s22, [#allocation6], %s1153_s26, %s1153_s26, %s1154_s27  }
   0x6   :  { %s19_s29 = sshll.u32 %s1155_s28, 4  ;;  %s1156_s30 = smov 448   ;;  %s20_s29 = int_to_ptr.vmem [resolvable:$true] %s19_s29 }
   0x7   :  { %s1157_s6 = smov 28   ;;  %s45_s8 = sshll.u32 %s1213_s3, 4  ;;  %s46_s8 = int_to_ptr.hbm [resolvable:$true] %s45_s8 }
   0x8   :  { %25 = dma.hbm_to_vmem [thread:$0]  %s18_s25, 896, %s20_s29, [#allocation3], %s1156_s30, %s1156_s30, %s1157_s6  }
   0x9   :  { %s1158_s9 = smov [#allocation7]  }
   0xa   :  { %s47_s10 = sshll.u32 %s1158_s9, 4  ;;  %s48_s10 = int_to_ptr.vmem [resolvable:$true] %s47_s10 }
   0xb   :  { %53 = dma.hbm_to_vmem [thread:$0]  %s46_s8, 1024, %s48_s10, [#allocation6], %s1153_s26, %s1153_s26, %s1154_s27  }
   0xc   :  { %1146 = dma.done.wait [#allocation3], 896  }
   0xd   :  { %1147 = vsyncadd [#allocation3], 4294966400 }
   0xe   :  { %1148 = dma.done.wait [#allocation6], 7296  }
   0xf   :  { %1149 = vsyncadd [#allocation6], 4294960000  ;;  %v988_v0 = vld [vmem:[#allocation5 + $0x38] sm:$0xff]  ;;  %v987_v4 = vld [vmem:[#allocation5 + $0x30] sm:$0xff]  ;;  %vm508_vm0 = vcmask 130048   ;;  %s1159_s12 = smov [#allocation8]  }
  0x10   :  { %v996_v1 = vld [vmem:[#allocation5 + $0x78] sm:$0xff]  ;;  %512 = vmatpush.bf16.msra.mxu0 %v988_v0  ;;  %v995_v5 = vld [vmem:[#allocation5 + $0x70] sm:$0xff]  ;;  %v986_v8 = vld [vmem:[#allocation5 + $0x28] sm:$0xff]  ;;  %s701_s13 = sshll.u32 %s1159_s12, 4  ;;  %s703_s16 = sshll.u32 %s1215_s5, 4  ;;  %s702_s13 = int_to_ptr.vmem [resolvable:$true] %s701_s13  ;;  %s704_s16 = int_to_ptr.hbm [resolvable:$true] %s703_s16 }
  0x11   :  { %v1004_v2 = vld [vmem:[#allocation5 + $0xb8] sm:$0xff]  ;;  %526 = vmatpush.bf16.msra.mxu1 %v996_v1  ;;  %v1003_v6 = vld [vmem:[#allocation5 + $0xb0] sm:$0xff]  ;;  %v994_v9 = vld [vmem:[#allocation5 + $0x68] sm:$0xff]  ;;  %s1160_s17 = smov 128   ;;  %s1161_s18 = smov 8  }
  0x12   :  { %v1012_v3 = vld [vmem:[#allocation5 + $0xf8] sm:$0xff]  ;;  %540 = vmatpush.bf16.msra.mxu2 %v1004_v2  ;;  %v1011_v7 = vld [vmem:[#allocation5 + $0xf0] sm:$0xff]  ;;  %v1002_v10 = vld [vmem:[#allocation5 + $0xa8] sm:$0xff] }
  0x13   :  { %554 = vmatpush.bf16.msra.mxu3 %v1012_v3  ;;  %v1010_v11 = vld [vmem:[#allocation5 + $0xe8] sm:$0xff]  ;;  %v985_v12 = vld [vmem:[#allocation5 + $0x20] sm:$0xff]  ;;  %v984_v16 = vld [vmem:[#allocation5 + $0x18] sm:$0xff] }
  0x14   :  { %513 = vmatpush.bf16.msra.mxu0 %v987_v4  ;;  %v993_v13 = vld [vmem:[#allocation5 + $0x60] sm:$0xff]  ;;  %v992_v17 = vld [vmem:[#allocation5 + $0x58] sm:$0xff]  ;;  %v983_v20 = vld [vmem:[#allocation5 + $0x10] sm:$0xff] }
  0x15   :  { %527 = vmatpush.bf16.msra.mxu1 %v995_v5  ;;  %v1001_v14 = vld [vmem:[#allocation5 + $0xa0] sm:$0xff]  ;;  %v1000_v18 = vld [vmem:[#allocation5 + $0x98] sm:$0xff]  ;;  %v991_v21 = vld [vmem:[#allocation5 + $0x50] sm:$0xff] }
  0x16   :  { %541 = vmatpush.bf16.msra.mxu2 %v1003_v6  ;;  %v1009_v15 = vld [vmem:[#allocation5 + $0xe0] sm:$0xff]  ;;  %v1008_v19 = vld [vmem:[#allocation5 + $0xd8] sm:$0xff]  ;;  %v999_v22 = vld [vmem:[#allocation5 + $0x90] sm:$0xff] }
  0x17   :  { %555 = vmatpush.bf16.msra.mxu3 %v1011_v7  ;;  %v1007_v23 = vld [vmem:[#allocation5 + $0xd0] sm:$0xff]  ;;  %v982_v24 = vld [vmem:[#allocation5 + $0x8] sm:$0xff]  ;;  %v981_v28 = vld [vmem:[#allocation5] sm:$0xff] }
  0x18   :  { %514 = vmatpush.bf16.msra.mxu0 %v986_v8  ;;  %v990_v25 = vld [vmem:[#allocation5 + $0x48] sm:$0xff]  ;;  %v989_v29 = vld [vmem:[#allocation5 + $0x40] sm:$0xff]  ;;  %v1020_v34 = vld [vmem:[#allocation5 + $0x138] sm:$0xff] }
  0x19   :  { %528 = vmatpush.bf16.msra.mxu1 %v994_v9  ;;  %v998_v26 = vld [vmem:[#allocation5 + $0x88] sm:$0xff]  ;;  %v977_v31 = vld [vmem:[#allocation2 + $0x18] sm:$0xf0]  ;;  %v1028_v35 = vld [vmem:[#allocation5 + $0x178] sm:$0xff] }
  0x1a   :  { %542 = vmatpush.bf16.msra.mxu2 %v1002_v10  ;;  %v1006_v27 = vld [vmem:[#allocation5 + $0xc8] sm:$0xff]  ;;  %v997_v36 = vld [vmem:[#allocation5 + $0x80] sm:$0xff]  ;;  %v727_v38 = vld [vmem:[#allocation2 + $0x8] sm:$0xf] }
  0x1b   :  { %556 = vmatpush.bf16.msra.mxu3 %v1010_v11  ;;  %v719_v30 = vld [vmem:[#allocation2] sm:$0xf]  ;;  %v974_v32 = vld [vmem:[#allocation2 + $0x4] sm:$0xf]  ;;  %v1005_v37 = vld [vmem:[#allocation5 + $0xc0] sm:$0xff] }
  0x1c   :  { %515 = vmatpush.bf16.msra.mxu0 %v985_v12  ;;  %v721_v33 = vld [vmem:[#allocation2 + $0x1c] sm:$0xf0]  ;;  %v978_v39 = vld [vmem:[#allocation2 + $0x20] sm:$0xf0]  ;;  %v720_v40 = vor.u32 %v977_v31, %v719_v30  ;;  %v975_v41 = vld [vmem:[#allocation2 + $0xc] sm:$0xf] }
  0x1d   :  { %529 = vmatpush.bf16.msra.mxu1 %v993_v13  ;;  %v729_v42 = vld [vmem:[#allocation2 + $0x24] sm:$0xf0]  ;;  %v724_v43 = vor.u32 %v974_v32, %v721_v33  ;;  %v1029_v44 = vld [vmem:[#allocation5 + $0x180] sm:$0xff]  ;;  %v728_v47 = vor.u32 %v978_v39, %v727_v38  ;;  %v1018_v49 = vld [vmem:[#allocation5 + $0x128] sm:$0xff] }
  0x1e   :  { %543 = vmatpush.bf16.msra.mxu2 %v1001_v14  ;;  %v1019_v45 = vld [vmem:[#allocation5 + $0x130] sm:$0xff]  ;;  %v732_v48 = vor.u32 %v975_v41, %v729_v42  ;;  %v1026_v50 = vld [vmem:[#allocation5 + $0x168] sm:$0xff]  ;;  %v1017_v51 = vld [vmem:[#allocation5 + $0x120] sm:$0xff] }
  0x1f   :  { %557 = vmatpush.bf16.msra.mxu3 %v1009_v15  ;;  %v1027_v46 = vld [vmem:[#allocation5 + $0x170] sm:$0xff]  ;;  %v1025_v52 = vld [vmem:[#allocation5 + $0x160] sm:$0xff]  ;;  %v1016_v53 = vld [vmem:[#allocation5 + $0x118] sm:$0xff] }
  0x20   :  { %516 = vmatpush.bf16.msra.mxu0 %v984_v16  ;;  %v1024_v54 = vld [vmem:[#allocation5 + $0x158] sm:$0xff]  ;;  %v743_v55 = vld [vmem:[#allocation2 + $0x18] sm:$0xf]  ;;  %v1015_v57 = vld [vmem:[#allocation5 + $0x110] sm:$0xff] }
  0x21   :  { %530 = vmatpush.bf16.msra.mxu1 %v992_v17  ;;  %v980_v56 = vld [vmem:[#allocation2 + $0x30] sm:$0xf0]  ;;  %v1023_v58 = vld [vmem:[#allocation5 + $0x150] sm:$0xff]  ;;  %v1014_v60 = vld [vmem:[#allocation5 + $0x108] sm:$0xff] }
  0x22   :  { %544 = vmatpush.bf16.msra.mxu2 %v1000_v18  ;;  %v744_v59 = vor.u32 %v980_v56, %v743_v55  ;;  %v1022_v61 = vld [vmem:[#allocation5 + $0x148] sm:$0xff]  ;;  %v1013_v62 = vld [vmem:[#allocation5 + $0x100] sm:$0xff]  ;;  %v735_v0 = vld [vmem:[#allocation2 + $0x10] sm:$0xf] }
  0x23   :  { %558 = vmatpush.bf16.msra.mxu3 %v1008_v19  ;;  %v1021_v63 = vld [vmem:[#allocation5 + $0x140] sm:$0xff]  ;;  %v979_v1 = vld [vmem:[#allocation2 + $0x28] sm:$0xf0]  ;;  %v976_v2 = vld [vmem:[#allocation2 + $0x14] sm:$0xf] }
  0x24   :  { %517 = vmatpush.bf16.msra.mxu0 %v983_v20  ;;  %v737_v3 = vld [vmem:[#allocation2 + $0x2c] sm:$0xf0]  ;;  %v736_v4 = vor.u32 %v979_v1, %v735_v0  ;;  %v1037_v6 = vld [vmem:[#allocation7 + $0x38] sm:$0xff]  ;;  %v1035_v8 = vld [vmem:[#allocation7 + $0x28] sm:$0xff] }
  0x25   :  { %531 = vmatpush.bf16.msra.mxu1 %v991_v21  ;;  %v740_v5 = vor.u32 %v976_v2, %v737_v3  ;;  %v1036_v7 = vld [vmem:[#allocation7 + $0x30] sm:$0xff]  ;;  %v1034_v9 = vld [vmem:[#allocation7 + $0x20] sm:$0xff]  ;;  %v1033_v10 = vld [vmem:[#allocation7 + $0x18] sm:$0xff] }
  0x26   :  { %545 = vmatpush.bf16.msra.mxu2 %v999_v22  ;;  %v1032_v11 = vld [vmem:[#allocation7 + $0x10] sm:$0xff]  ;;  %v1031_v12 = vld [vmem:[#allocation7 + $0x8] sm:$0xff]  ;;  %v1030_v16 = vld [vmem:[#allocation7] sm:$0xff] }
  0x27   :  { %559 = vmatpush.bf16.msra.mxu3 %v1007_v23  ;;  %v1048_v17 = vld [vmem:[%s1212_s2] ss:$0 sm:$0xff] }
  0x28   :  { %518 = vmatpush.bf16.msra.mxu0 %v982_v24 }
  0x29   :  { %532 = vmatpush.bf16.msra.mxu1 %v990_v25 }
  0x2a   :  { %546 = vmatpush.bf16.msra.mxu2 %v998_v26 }
  0x2b   :  { %560 = vmatpush.bf16.msra.mxu3 %v1006_v27 }
  0x2c   :  { %519 = vmatpush.bf16.msra.mxu0 %v981_v28 }
  0x2d   :  { %533 = vmatpush.bf16.msra.mxu1 %v989_v29 }
  0x2e   :  { %547 = vmatpush.bf16.msra.mxu2 %v997_v36 }
  0x2f   :  { %561 = vmatpush.bf16.msra.mxu3 %v1005_v37  ;;  %520 = vmatmul.bf16.vlgmr.msra.gmra.mxu0 %v720_v40 }
  0x30   :  { %568 = vmatpush.bf16.msrb.mxu0 %v1020_v34  ;;  %534 = vmatmul.bf16.vlgmr.msra.gmra.mxu1 %v724_v43 }
  0x31   :  { %582 = vmatpush.bf16.msrb.mxu1 %v1028_v35  ;;  %548 = vmatmul.bf16.vlgmr.msra.gmra.mxu2 %v728_v47 }
  0x32   :  { %603 = vmatpush.bf16.msrb.mxu2 %v1029_v44  ;;  %562 = vmatmul.bf16.vlgmr.msra.gmra.mxu3 %v732_v48 }
  0x33   :  { %681 = vmatpush.bf16.msrb.mxu3 %v1037_v6 }
  0x34   :  { %569 = vmatpush.bf16.msrb.mxu0 %v1019_v45 }
  0x35   :  { %583 = vmatpush.bf16.msrb.mxu1 %v1027_v46  ;;  %v1049_v46 = vld [vmem:[%s1214_s4] ss:$0 sm:$0xff] }
  0x37   :  { %682 = vmatpush.bf16.msrb.mxu3 %v1036_v7 }
  0x38   :  { %570 = vmatpush.bf16.msrb.mxu0 %v1018_v49 }
  0x39   :  { %584 = vmatpush.bf16.msrb.mxu1 %v1026_v50 }
  0x3b   :  { %683 = vmatpush.bf16.msrb.mxu3 %v1035_v8 }
  0x3c   :  { %571 = vmatpush.bf16.msrb.mxu0 %v1017_v51 }
  0x3d   :  { %585 = vmatpush.bf16.msrb.mxu1 %v1025_v52 }
  0x3f   :  { %684 = vmatpush.bf16.msrb.mxu3 %v1034_v9 }
  0x40   :  { %572 = vmatpush.bf16.msrb.mxu0 %v1016_v53 }
  0x41   :  { %586 = vmatpush.bf16.msrb.mxu1 %v1024_v54  ;;  %941 = vmatmul.msk.bf16.vlgmr.msrb.gmra.mxu2 %vm508_vm0, %v744_v59 }
  0x43   :  { %685 = vmatpush.bf16.msrb.mxu3 %v1033_v10 }
  0x44   :  { %573 = vmatpush.bf16.msrb.mxu0 %v1015_v57 }
  0x45   :  { %587 = vmatpush.bf16.msrb.mxu1 %v1023_v58 }
  0x47   :  { %686 = vmatpush.bf16.msrb.mxu3 %v1032_v11 }
  0x48   :  { %574 = vmatpush.bf16.msrb.mxu0 %v1014_v60 }
  0x49   :  { %588 = vmatpush.bf16.msrb.mxu1 %v1022_v61 }
  0x4b   :  { %687 = vmatpush.bf16.msrb.mxu3 %v1031_v12 }
  0x4c   :  { %575 = vmatpush.bf16.msrb.mxu0 %v1013_v62 }
  0x4d   :  { %589 = vmatpush.bf16.msrb.mxu1 %v1021_v63 }
  0x4f   :  { %576 = vmatmul.bf16.vlgmr.msrb.gmra.mxu0 %v736_v4  ;;  %688 = vmatpush.bf16.msrb.mxu3 %v1030_v16 }
  0x50   :  { %590 = vmatmul.bf16.vlgmr.msrb.gmra.mxu1 %v740_v5 }
  0xac   :  { %v521_v13 = vpop.f32.mrf.mxu0 }
  0xad   :  { %v535_v14 = vpop.f32.mrf.mxu1  ;;  %v522_v18 = vadd.f32 %v1048_v17, %v521_v13 }
  0xaf   :  { %v536_v22 = vadd.f32 %v535_v14, %v522_v18 }
  0xb4   :  { %v549_v15 = vpop.f32.mrf.mxu2  ;;  %v523_v19 = vpop.f32.mrf.mxu0 }
  0xb5   :  { %v537_v20 = vpop.f32.mrf.mxu1  ;;  %v563_v23 = vpop.f32.mrf.mxu3  ;;  %v524_v24 = vadd.f32 %v1048_v17, %v523_v19  ;;  %v550_v25 = vadd.f32 %v549_v15, %v536_v22 }
  0xb7   :  { %v538_v26 = vadd.f32 %v537_v20, %v524_v24  ;;  %v564_v29 = vadd.f32 %v563_v23, %v550_v25 }
  0xbc   :  { %v551_v21 = vpop.f32.mrf.mxu2 }
  0xbd   :  { %v552_v31 = vadd.f32 %v551_v21, %v538_v26  ;;  %v565_v33 = vpop.f32.mrf.mxu3 }
  0xbf   :  { %v566_v34 = vadd.f32 %v565_v33, %v552_v31 }
  0xc4   :  { %v605_v30 = vpop.f32.mrf.mxu2 }
  0xcc   :  { %v577_v27 = vpop.f32.mrf.mxu0  ;;  %v607_v41 = vpop.f32.mrf.mxu2 }
  0xcd   :  { %v591_v28 = vpop.f32.mrf.mxu1  ;;  %v578_v32 = vadd.f32 %v577_v27, %v564_v29 }
  0xcf   :  { %v592_v35 = vadd.f32 %v591_v28, %v578_v32 }
  0xd1   :  { %v606_v39 = vadd.f32 %v605_v30, %v592_v35 }
  0xd3   :  { %v610_v43 = vmax.f32 %v606_v39, 0.0 }
  0xd4   :  { %v579_v36 = vpop.f32.mrf.mxu0 }
  0xd5   :  { %v580_v37 = vadd.f32 %v579_v36, %v566_v34  ;;  %v593_v38 = vpop.f32.mrf.mxu1 }
  0xd7   :  { %v594_v40 = vadd.f32 %v593_v38, %v580_v37 }
  0xd9   :  { %v608_v42 = vadd.f32 %v607_v41, %v594_v40 }
  0xdb   :  { %v611_v44 = vmax.f32 %v608_v42, 0.0 }
  0xdd   :  { %v612_v45 = vpack.c.bf16 %v611_v44, %v610_v43 }
  0xdf   :  { %689 = vmatmul.bf16.vlgmr.msrb.gmra.mxu3 %v612_v45 }
 0x162   :  { %v690_v47 = vpop.f32.mrf.mxu3 }
 0x163   :  { %v691_v48 = vadd.f32 %v1049_v46, %v690_v47 }
 0x165   :  { %695 = vst [vmem:[#allocation8] sm:$0xff] %v691_v48 }
 0x16a   :  { %v692_v49 = vpop.f32.mrf.mxu3 }
 0x16b   :  { %v693_v50 = vadd.f32 %v1049_v46, %v692_v49 }
 0x16d   :  { %696 = vst [vmem:[#allocation8 + $0x8] sm:$0xff] %v693_v50 }
 0x16e   :  { %709 = dma.vmem_to_hbm [thread:$0]  %s702_s13, 256, %s704_s16, [#allocation4], %s1160_s17, %s1160_s17, %s1161_s18  }
 0x16f   :  { %1150 = dma.done.wait [#allocation4], 256  }
 0x170   :  { %1151 = vsyncadd [#allocation4], 4294967040 }
 0x171   :  { %714 = vsyncpa [#allocation3], 1 }
 0x172   :  { %715 = vsyncpa [#allocation6], 1 }
 0x173   :  { %716 = vsyncpa [#allocation4], 1 }

</bundles_post_ra>
